<compile_context>
chip_gen: v6e
topology: v6e:2x2x1
jax: 0.10.0
libtpu: 0.0.40
codegen_flags: <defaults>
</compile_context>

<pallas_src>
import jax
import jax.numpy as jnp
from jax.experimental import pallas as pl
from jax.experimental.pallas import tpu as pltpu

LANE = 128


def _round_up(x, m):
    return ((x + m - 1) // m) * m


def _pad_to(x, shape):
    return jnp.pad(x, [(0, t - s) for s, t in zip(x.shape, shape)])


def _pick_batch_tile(B, S, Hb, itemsize=2, budget_bytes=8 * 1024 * 1024):
    """Cap the batch tile so a double-buffered bf16 h_x tile stays well under
    the scoped-VMEM budget (sized for v7x's 64 MiB physical / 32 MiB scoped)."""
    per_row = max(1, S * Hb * itemsize)
    tb = budget_bytes // (2 * per_row)
    tb = max(8, (tb // 8) * 8)            # sublane-aligned
    return int(min(tb, _round_up(B, 8)))


# --------------------------------------------------------------------------
# Kernel 1: label / GNN branch (batch-independent, runs once, f32)
# --------------------------------------------------------------------------
def label_gnn_kernel(lab_ref, rdw_ref, rdb_ref, ahat_ref,
                     g1w_ref, g1b_ref, g2w_ref, g2b_ref, xn_ref):
    lab = lab_ref[...]                                              # (Np, Hb)
    le = jnp.dot(lab, rdw_ref[...],
                 preferred_element_type=jnp.float32) + rdb_ref[...]  # (Np, Hp)
    a_hat = ahat_ref[...]                                           # (Np, Np)

    # GCNConv 1: relu(A_hat @ (X @ W1) + b1)
    x1 = jnp.dot(a_hat,
                 jnp.dot(le, g1w_ref[...], preferred_element_type=jnp.float32),
                 preferred_element_type=jnp.float32) + g1b_ref[...]
    x1 = jnp.maximum(x1, 0.0)

    # GCNConv 2: A_hat @ (X @ W2) + b2
    x2 = jnp.dot(a_hat,
                 jnp.dot(x1, g2w_ref[...], preferred_element_type=jnp.float32),
                 preferred_element_type=jnp.float32) + g2b_ref[...]  # (Np, Gp)

    # F.normalize(p=2, dim=-1, eps=1e-12)  ==  x * rsqrt(max(sum(x^2), eps^2))
    sumsq = jnp.sum(x2 * x2, axis=-1, keepdims=True)
    xn_ref[...] = x2 * jax.lax.rsqrt(jnp.maximum(sumsq, 1e-24))


# --------------------------------------------------------------------------
# Kernel 2: text branch + cosine similarity (gridded over batch tiles)
# --------------------------------------------------------------------------
def text_sim_kernel(h_ref, aw1_ref, ab1_ref, aw2_ref,
                    rtw_ref, rtb_ref, xn_ref, sim_ref):
    h = h_ref[...]                                   # (TB, S, Hb) bf16
    TB, S, Hb = h.shape
    h2 = h.reshape(TB * S, Hb)

    # attention hidden layer: bf16 MXU matmul, f32 accumulation
    t = jnp.tanh(jnp.dot(h2, aw1_ref[...],
                         preferred_element_type=jnp.float32) + ab1_ref[...])
    Hp = t.shape[-1]
    t3 = t.reshape(TB, S, Hp)

    # attention score: VPU reduction instead of an N=1 matmul; lane-major (TB,S).
    # The final scalar bias of the scorer is omitted: softmax is shift-invariant.
    scores = jnp.sum(t3 * aw2_ref[...], axis=-1)                    # (TB, S)

    # softmax over the sequence axis (lane axis)
    m = jnp.max(scores, axis=-1, keepdims=True)
    e = jnp.exp(scores - m)
    w = e * pl.reciprocal(jnp.sum(e, axis=-1, keepdims=True), approx=True)

    # attention pooling as an MXU contraction
    hw = jnp.einsum('bs,bsh->bh', w.astype(jnp.bfloat16), h,
                    preferred_element_type=jnp.float32)             # (TB, Hb)

    # reduce_text_dim
    h_red = jnp.dot(hw.astype(jnp.bfloat16), rtw_ref[...],
                    preferred_element_type=jnp.float32) + rtb_ref[...]  # (TB, Gp)

    # L2 normalize (eps=1e-12)
    sumsq = jnp.sum(h_red * h_red, axis=-1, keepdims=True)
    hn = h_red * jax.lax.rsqrt(jnp.maximum(sumsq, 1e-24))

    # cosine similarity: contract last dims of both operands (no transpose)
    sim_ref[...] = jax.lax.dot_general(
        hn, xn_ref[...],
        dimension_numbers=(((1,), (1,)), ((), ())),
        preferred_element_type=jnp.float32)                         # (TB, Np)


# --------------------------------------------------------------------------
# Glue (plain JAX)
# --------------------------------------------------------------------------
def _build_a_hat(edge_index, n):
    """Symmetric-normalized adjacency with (remaining) self-loops, as used by
    GCNConv: A_hat = D^{-1/2} (A + I_missing) D^{-1/2}, A[target, source] += 1
    per edge (duplicate edges accumulate)."""
    src, dst = edge_index[0], edge_index[1]
    a = jnp.zeros((n, n), jnp.float32).at[dst, src].add(1.0)
    diag = jnp.diagonal(a)
    a = a + jnp.diag(jnp.where(diag == 0.0, 1.0, 0.0))   # add remaining self-loops
    deg = jnp.sum(a, axis=1)
    dinv = jnp.where(deg > 0.0, jax.lax.rsqrt(deg), 0.0)
    return dinv[:, None] * a * dinv[None, :]


def init_params(key, vocab_size, bert_hidden_dim, hidden_dim, gnn_output_dim):
    ks = jax.random.split(key, 12)
    s = 0.05
    return {
        # TODO(synk): stand-in for the full pretrained BERT encoder.
        "emb":     jax.random.normal(ks[0], (vocab_size, bert_hidden_dim), jnp.float32) * s,
        # attention = Linear(Hb, hidden) -> Tanh -> Linear(hidden, 1)
        "attn_w1": jax.random.normal(ks[1], (bert_hidden_dim, hidden_dim), jnp.float32) * s,
        "attn_b1": jax.random.normal(ks[2], (1, hidden_dim), jnp.float32) * s,
        "attn_w2": jax.random.normal(ks[3], (hidden_dim, 1), jnp.float32) * s,
        "attn_b2": jax.random.normal(ks[4], (1, 1), jnp.float32) * s,
        # reduce_dim: Linear(Hb, hidden)  (applied to label embeddings)
        "rd_w":    jax.random.normal(ks[5], (bert_hidden_dim, hidden_dim), jnp.float32) * s,
        "rd_b":    jax.random.normal(ks[6], (1, hidden_dim), jnp.float32) * s,
        # reduce_text_dim: Linear(Hb, gnn_output_dim)
        "rt_w":    jax.random.normal(ks[7], (bert_hidden_dim, gnn_output_dim), jnp.float32) * s,
        "rt_b":    jax.random.normal(ks[8], (1, gnn_output_dim), jnp.float32) * s,
        # GCNConv1: hidden -> gnn_output_dim, GCNConv2: gnn_output_dim -> gnn_output_dim
        "g1_w":    jax.random.normal(ks[9], (hidden_dim, gnn_output_dim), jnp.float32) * s,
        "g1_b":    jnp.zeros((1, gnn_output_dim), jnp.float32),
        "g2_w":    jax.random.normal(ks[10], (gnn_output_dim, gnn_output_dim), jnp.float32) * s,
        "g2_b":    jnp.zeros((1, gnn_output_dim), jnp.float32),
    }


def hagcm_forward(params, input_ids, attention_mask, edge_index,
                  label_embeddings, batch_tile=None):
    # TODO(synk): full BERT(input_ids, attention_mask) encoder has no clean
    # Pallas equivalent here; replaced by a deterministic embedding lookup
    # producing last_hidden_state.  attention_mask only feeds BERT in the
    # original module (the pooling softmax there is unmasked), so it is unused.
    del attention_mask
    h_x = params["emb"][input_ids]                     # (B, S, Hb) f32
    B, S, Hb = h_x.shape
    N = label_embeddings.shape[0]
    hidden = params["attn_w1"].shape[1]
    gout = params["rt_w"].shape[1]

    # lane-dense padded sizes (zero-padding is exactly value-preserving here)
    Hp = _round_up(hidden, LANE)
    Gp = _round_up(gout, LANE)
    Np = _round_up(N, LANE)

    # ---------------- label / GNN branch: run ONCE (batch-independent) -------
    a_hat = _pad_to(_build_a_hat(edge_index, N), (Np, Np))
    lab_p = _pad_to(label_embeddings.astype(jnp.float32), (Np, Hb))
    rd_w = _pad_to(params["rd_w"], (Hb, Hp))
    rd_b = _pad_to(params["rd_b"], (1, Hp))
    g1_w = _pad_to(params["g1_w"], (Hp, Gp))
    g1_b = _pad_to(params["g1_b"], (1, Gp))
    g2_w = _pad_to(params["g2_w"], (Gp, Gp))
    g2_b = _pad_to(params["g2_b"], (1, Gp))

    vmem = pl.BlockSpec(memory_space=pltpu.MemorySpace.VMEM)
    xn = pl.pallas_call(
        label_gnn_kernel,
        out_shape=jax.ShapeDtypeStruct((Np, Gp), jnp.float32),
        in_specs=[vmem] * 8,
        out_specs=vmem,
    )(lab_p, rd_w, rd_b, a_hat, g1_w, g1_b, g2_w, g2_b)

    # ---------------- text branch: grid over batch tiles ---------------------
    if batch_tile is None:
        batch_tile = _pick_batch_tile(B, S, Hb)
    TB = int(batch_tile)
    Bp = _round_up(B, TB)

    h_bf16 = _pad_to(h_x, (Bp, S, Hb)).astype(jnp.bfloat16)
    aw1 = _pad_to(params["attn_w1"], (Hb, Hp)).astype(jnp.bfloat16)
    ab1 = _pad_to(params["attn_b1"], (1, Hp))
    aw2 = _pad_to(params["attn_w2"].reshape(1, hidden), (1, Hp))
    rt_w = _pad_to(params["rt_w"], (Hb, Gp)).astype(jnp.bfloat16)
    rt_b = _pad_to(params["rt_b"], (1, Gp))

    grid = (Bp // TB,)

    flops = (2 * Bp * S * Hb * Hp        # attention hidden matmul
             + 2 * Bp * S * Hp           # score reduction
             + 2 * Bp * S * Hb           # attention-weighted sum
             + 2 * Bp * Hb * Gp          # reduce_text_dim
             + 2 * Bp * Gp * Np)         # cosine similarity
    transcendentals = Bp * S * Hp + Bp * S           # tanh + exp
    bytes_accessed = (h_bf16.size * 2
                      + (aw1.size + rt_w.size) * 2
                      + (ab1.size + aw2.size + rt_b.size + xn.size) * 4
                      + Bp * Np * 4)

    full2d = lambda b: (0, 0)
    sim_p = pl.pallas_call(
        text_sim_kernel,
        out_shape=jax.ShapeDtypeStruct((Bp, Np), jnp.float32),
        grid=grid,
        in_specs=[
            pl.BlockSpec((TB, S, Hb), lambda b: (b, 0, 0)),   # h_x tile (pipelined)
            pl.BlockSpec((Hb, Hp), full2d),                   # attn_w1 (bf16)
            pl.BlockSpec((1, Hp), full2d),                    # attn_b1
            pl.BlockSpec((1, Hp), full2d),                    # attn_w2 (as row vector)
            pl.BlockSpec((Hb, Gp), full2d),                   # rt_w (bf16)
            pl.BlockSpec((1, Gp), full2d),                    # rt_b
            pl.BlockSpec((Np, Gp), full2d),                   # normalized label nodes
        ],
        out_specs=pl.BlockSpec((TB, Np), lambda b: (b, 0)),
        compiler_params=pltpu.CompilerParams(
            dimension_semantics=("parallel",),
            vmem_limit_bytes=32 * 1024 * 1024,
        ),
        cost_estimate=pl.CostEstimate(
            flops=int(flops),
            transcendentals=int(transcendentals),
            bytes_accessed=int(bytes_accessed)),
    )(h_bf16, aw1, ab1, aw2, rt_w, rt_b, xn)

    return sim_p[:B, :N]


# --------------------------------------------------------------------------
# Pure-JAX reference (f32) for a sanity check
# --------------------------------------------------------------------------
def reference_forward(params, input_ids, attention_mask, edge_index,
                      label_embeddings):
    del attention_mask
    h = params["emb"][input_ids]                                   # (B,S,Hb)
    t = jnp.tanh(h @ params["attn_w1"] + params["attn_b1"])
    scores = t @ params["attn_w2"] + params["attn_b2"]             # (B,S,1)
    w = jax.nn.softmax(scores, axis=1)
    hw = jnp.sum(w * h, axis=1)                                    # (B,Hb)
    h_red = hw @ params["rt_w"] + params["rt_b"]

    le = label_embeddings @ params["rd_w"] + params["rd_b"]
    a_hat = _build_a_hat(edge_index, label_embeddings.shape[0])
    x1 = jnp.maximum(a_hat @ (le @ params["g1_w"]) + params["g1_b"], 0.0)
    x2 = a_hat @ (x1 @ params["g2_w"]) + params["g2_b"]

    hn = h_red / jnp.maximum(jnp.linalg.norm(h_red, axis=-1, keepdims=True), 1e-12)
    xn = x2 / jnp.maximum(jnp.linalg.norm(x2, axis=-1, keepdims=True), 1e-12)
    return hn @ xn.T


if __name__ == "__main__":
    # Small, module-consistent shapes (B=16 with batch_tile=8 exercises the grid).
    B, S = 16, 8
    VOCAB = 100
    BERT_HIDDEN = 32            # stand-in for bert.config.hidden_size (768)
    HIDDEN = 32                 # hidden_dim
    GNN_OUT = 16                # gnn_output_dim
    N_LABELS = 4

    key = jax.random.PRNGKey(0)
    k_param, k_ids, k_lab = jax.random.split(key, 3)

    params = init_params(k_param, VOCAB, BERT_HIDDEN, HIDDEN, GNN_OUT)

    input_ids = jax.random.randint(k_ids, (B, S), 0, VOCAB, dtype=jnp.int32)
    attention_mask = jnp.ones((B, S), dtype=jnp.int32)
    edge_index = jnp.array([[0, 1, 2, 3, 1],
                            [1, 2, 3, 0, 3]], dtype=jnp.int32)     # (2, E)
    label_embeddings = jax.random.normal(
        k_lab, (N_LABELS, BERT_HIDDEN), dtype=jnp.float32)

    sim = hagcm_forward(params, input_ids, attention_mask,
                        edge_index, label_embeddings, batch_tile=8)
    sim = jax.block_until_ready(sim)
    assert sim.shape == (B, N_LABELS)

    ref = reference_forward(params, input_ids, attention_mask,
                            edge_index, label_embeddings)
    err = float(jnp.max(jnp.abs(sim - ref)))
    assert err < 0.1, f"max abs error vs reference: {err}"

    print("KERNEL_OK")
</pallas_src>

<mosaic_0001>
module attributes {stable_mosaic.version = 11 : i64} {
  func.func @label_gnn_kernel(%arg0: memref<128x32xf32, #tpu.memory_space<vmem>>, %arg1: memref<32x128xf32, #tpu.memory_space<vmem>>, %arg2: memref<1x128xf32, #tpu.memory_space<vmem>>, %arg3: memref<128x128xf32, #tpu.memory_space<vmem>>, %arg4: memref<128x128xf32, #tpu.memory_space<vmem>>, %arg5: memref<1x128xf32, #tpu.memory_space<vmem>>, %arg6: memref<128x128xf32, #tpu.memory_space<vmem>>, %arg7: memref<1x128xf32, #tpu.memory_space<vmem>>, %arg8: memref<128x128xf32, #tpu.memory_space<vmem>>) attributes {dimension_semantics = [], scalar_prefetch = 0 : i64, scratch_operands = 0 : i64, tpu.core_type = #tpu.core_type<tc>} {
    %c0 = arith.constant 0 : index
    %c0_0 = arith.constant 0 : index
    %0 = vector.load %arg0[%c0, %c0_0] : memref<128x32xf32, #tpu.memory_space<vmem>>, vector<128x32xf32>
    %c0_1 = arith.constant 0 : index
    %c0_2 = arith.constant 0 : index
    %1 = vector.load %arg1[%c0_1, %c0_2] : memref<32x128xf32, #tpu.memory_space<vmem>>, vector<32x128xf32>
    %cst = arith.constant dense<0.000000e+00> : vector<128x128xf32>
    %2 = tpu.matmul %0, %1, %cst {dimension_numbers = #tpu.dot_dimension_numbers<[1], [0], [0], [1], [0, 0, 1, 1], [], []>} : vector<128x32xf32>, vector<32x128xf32>, vector<128x128xf32> -> vector<128x128xf32>
    %c0_3 = arith.constant 0 : index
    %c0_4 = arith.constant 0 : index
    %3 = vector.load %arg2[%c0_3, %c0_4] : memref<1x128xf32, #tpu.memory_space<vmem>>, vector<1x128xf32>
    %4 = vector.broadcast %3 : vector<1x128xf32> to vector<128x128xf32>
    %5 = arith.addf %2, %4 : vector<128x128xf32>
    %c0_5 = arith.constant 0 : index
    %c0_6 = arith.constant 0 : index
    %6 = vector.load %arg3[%c0_5, %c0_6] : memref<128x128xf32, #tpu.memory_space<vmem>>, vector<128x128xf32>
    %c0_7 = arith.constant 0 : index
    %c0_8 = arith.constant 0 : index
    %7 = vector.load %arg4[%c0_7, %c0_8] : memref<128x128xf32, #tpu.memory_space<vmem>>, vector<128x128xf32>
    %cst_9 = arith.constant dense<0.000000e+00> : vector<128x128xf32>
    %8 = tpu.matmul %5, %7, %cst_9 {dimension_numbers = #tpu.dot_dimension_numbers<[1], [0], [0], [1], [0, 0, 1, 1], [], []>} : vector<128x128xf32>, vector<128x128xf32>, vector<128x128xf32> -> vector<128x128xf32>
    %cst_10 = arith.constant dense<0.000000e+00> : vector<128x128xf32>
    %9 = tpu.matmul %6, %8, %cst_10 {dimension_numbers = #tpu.dot_dimension_numbers<[1], [0], [0], [1], [0, 0, 1, 1], [], []>} : vector<128x128xf32>, vector<128x128xf32>, vector<128x128xf32> -> vector<128x128xf32>
    %c0_11 = arith.constant 0 : index
    %c0_12 = arith.constant 0 : index
    %10 = vector.load %arg5[%c0_11, %c0_12] : memref<1x128xf32, #tpu.memory_space<vmem>>, vector<1x128xf32>
    %11 = vector.broadcast %10 : vector<1x128xf32> to vector<128x128xf32>
    %12 = arith.addf %9, %11 : vector<128x128xf32>
    %cst_13 = arith.constant 0.000000e+00 : f32
    %13 = vector.broadcast %cst_13 : f32 to vector<128x128xf32>
    %14 = arith.maximumf %12, %13 : vector<128x128xf32>
    %c0_14 = arith.constant 0 : index
    %c0_15 = arith.constant 0 : index
    %15 = vector.load %arg6[%c0_14, %c0_15] : memref<128x128xf32, #tpu.memory_space<vmem>>, vector<128x128xf32>
    %cst_16 = arith.constant dense<0.000000e+00> : vector<128x128xf32>
    %16 = tpu.matmul %14, %15, %cst_16 {dimension_numbers = #tpu.dot_dimension_numbers<[1], [0], [0], [1], [0, 0, 1, 1], [], []>} : vector<128x128xf32>, vector<128x128xf32>, vector<128x128xf32> -> vector<128x128xf32>
    %cst_17 = arith.constant dense<0.000000e+00> : vector<128x128xf32>
    %17 = tpu.matmul %6, %16, %cst_17 {dimension_numbers = #tpu.dot_dimension_numbers<[1], [0], [0], [1], [0, 0, 1, 1], [], []>} : vector<128x128xf32>, vector<128x128xf32>, vector<128x128xf32> -> vector<128x128xf32>
    %c0_18 = arith.constant 0 : index
    %c0_19 = arith.constant 0 : index
    %18 = vector.load %arg7[%c0_18, %c0_19] : memref<1x128xf32, #tpu.memory_space<vmem>>, vector<1x128xf32>
    %19 = vector.broadcast %18 : vector<1x128xf32> to vector<128x128xf32>
    %20 = arith.addf %17, %19 : vector<128x128xf32>
    %21 = arith.mulf %20, %20 : vector<128x128xf32>
    %cst_20 = arith.constant dense<0.000000e+00> : vector<128xf32>
    %22 = vector.multi_reduction <add>, %21, %cst_20 [1] : vector<128x128xf32> to vector<128xf32>
    %23 = vector.shape_cast %22 : vector<128xf32> to vector<128x1xf32>
    %cst_21 = arith.constant 1.000000e-24 : f32
    %24 = vector.broadcast %cst_21 : f32 to vector<128x1xf32>
    %25 = arith.maximumf %23, %24 : vector<128x1xf32>
    %26 = math.rsqrt %25 : vector<128x1xf32>
    %27 = vector.broadcast %26 : vector<128x1xf32> to vector<128x128xf32>
    %28 = arith.mulf %20, %27 : vector<128x128xf32>
    %c0_22 = arith.constant 0 : index
    %c0_23 = arith.constant 0 : index
    %29 = vector.load %arg8[%c0_22, %c0_23] : memref<128x128xf32, #tpu.memory_space<vmem>>, vector<128x128xf32>
    tpu.vector_store %arg8[%c0_22, %c0_23], %28 {strides = array<i32>} : memref<128x128xf32, #tpu.memory_space<vmem>>, vector<128x128xf32>,
    return
  }
}

</mosaic_0001>

<bundles_post_ra>
// kernel: tpu_custom_call.1
= control target key start
LH: loop header
LB: loop body
LE: loop exit
PB: predicated region body
PF: predicated region fallthrough
CT: control target
= control target key end

     0   :  { %13 = vsyncpa [#allocation3], 0  ;;  %s1994_s0 = inlined_call_operand.vmem [shape: f32[128,32], index: 0, kind: input, shape index: {}]   ;;  %s1995_s1 = inlined_call_operand.vmem [shape: f32[32,128], index: 1, kind: input, shape index: {}]   ;;  %s1996_s2 = inlined_call_operand.vmem [shape: f32[1,128], index: 2, kind: input, shape index: {}]   ;;  %s1997_s3 = inlined_call_operand.vmem [shape: f32[128,128], index: 3, kind: input, shape index: {}]   ;;  %s1998_s4 = inlined_call_operand.hbm [shape: f32[128,128], index: 4, kind: input, shape index: {}]   ;;  %s1999_s5 = inlined_call_operand.vmem [shape: f32[1,128], index: 5, kind: input, shape index: {}]   ;;  %s2000_s6 = inlined_call_operand.hbm [shape: f32[128,128], index: 6, kind: input, shape index: {}]   ;;  %s2001_s7 = inlined_call_operand.vmem [shape: f32[1,128], index: 7, kind: input, shape index: {}]   ;;  %s2002_s8 = inlined_call_operand.hbm [shape: f32[128,128], index: 8, kind: output, shape index: {}]  }
   0x1   :  { %14 = vsyncpa [#allocation6], 0 }
   0x2   :  { %15 = vsyncpa [#allocation4], 0  ;;  %s1625_s27 = smov [#allocation2]  }
   0x3   :  { %s29_s28 = sshll.u32 %s1625_s27, 4  ;;  %s30_s28 = int_to_ptr.vmem [resolvable:$true] %s29_s28 }
   0x4   :  { %s1567_s29 = scalar_lea.vmem %s30_s28, 2048  ;;  %p1572_p1 = scmp.lt.s32.totalorder %s30_s28, %s30_s28 }
   0x5   :  { %p1568_p0 = scmp.ne.s32.totalorder %s30_s28, %s1567_s29  ;;  %p1573_p2 = scmp.lt.s32.totalorder %s1567_s29, %s1567_s29 }
   0x7   :  { %p1574_p3 = por %p1573_p2, %p1572_p1 }
   0x9   :  { %p1575_p4 = pnand %p1574_p3, %p1568_p0 }
   0xb   :  { %1578 = shalt.err (!%p1575_p4)
}
   0xc   :  { %s1626_s30 = smov 128   ;;  %s1627_s9 = smov 8  }
   0xd   :  { %35 = dma.hbm_to_vmem [thread:$0]  %s1998_s4, 2048, %s30_s28, [#allocation3], %s1626_s30, %s1626_s30, %s1627_s9  }
   0xe   :  { %s1628_s12 = smov [#allocation5]  }
   0xf   :  { %s43_s13 = sshll.u32 %s1628_s12, 4  ;;  %s44_s13 = int_to_ptr.vmem [resolvable:$true] %s43_s13 }
  0x10   :  { %s1587_s14 = scalar_lea.vmem %s44_s13, 2048  ;;  %p1592_p6 = scmp.lt.s32.totalorder %s44_s13, %s44_s13 }
  0x11   :  { %p1588_p5 = scmp.ne.s32.totalorder %s44_s13, %s1587_s14  ;;  %p1593_p7 = scmp.lt.s32.totalorder %s1587_s14, %s1587_s14 }
  0x13   :  { %p1594_p8 = por %p1593_p7, %p1592_p6 }
  0x15   :  { %p1595_p9 = pnand %p1594_p8, %p1588_p5 }
  0x17   :  { %1598 = shalt.err (!%p1595_p9)
}
  0x18   :  { %49 = dma.hbm_to_vmem [thread:$0]  %s2000_s6, 2048, %s44_s13, [#allocation6], %s1626_s30, %s1626_s30, %s1627_s9  }
  0x19   :  { %1619 = dma.done.wait [#allocation3], 2048  }
  0x1a   :  { %1620 = vsyncadd [#allocation3], 4294965248 }
  0x1b   :  { %1621 = dma.done.wait [#allocation6], 2048  }
  0x1c   :  { %1622 = vsyncadd [#allocation6], 4294965248  ;;  %vm85_vm0 = vcmask 261120   ;;  %v77_v0 = vld [vmem:[%s1995_s1 + $0x18] sm:$0xff]  ;;  %v76_v1 = vld [vmem:[%s1995_s1 + $0x10] sm:$0xff] }
  0x1d   :  { %1234 = vmatprep.subr.mxu0 %v77_v0  ;;  %v58_v2 = vld [vmem:[%s1994_s0] sm:$0xff]  ;;  %v75_v3 = vld [vmem:[%s1995_s1 + $0x8] sm:$0xff]  ;;  %v310_v6 = vld [vmem:[#allocation2 + $0x78] sm:$0xff] }
  0x1e   :  { %1235 = vmatpush3.msra.mxu0 %v77_v0  ;;  %1242 = vmatprep.mubr.msk.f32.mxu0 %vm85_vm0, %v58_v2  ;;  %v74_v4 = vld [vmem:[%s1995_s1] sm:$0xff]  ;;  %v59_v5 = vld [vmem:[%s1994_s0 + $0x8] sm:$0xff]  ;;  %v60_v7 = vld [vmem:[%s1994_s0 + $0x10] sm:$0xff] }
  0x1f   :  { %1236 = vmatprep.subr.mxu0 %v76_v1  ;;  %1266 = vmatprep.subr.mxu1 %v310_v6  ;;  %v309_v8 = vld [vmem:[#allocation2 + $0x70] sm:$0xff]  ;;  %v308_v9 = vld [vmem:[#allocation2 + $0x68] sm:$0xff]  ;;  %v61_v10 = vld [vmem:[%s1994_s0 + $0x18] sm:$0xff] }
  0x20   :  { %1237 = vmatpush3.msra.mxu0 %v76_v1  ;;  %1267 = vmatpush3.msra.mxu1 %v310_v6  ;;  %v307_v11 = vld [vmem:[#allocation2 + $0x60] sm:$0xff]  ;;  %v306_v13 = vld [vmem:[#allocation2 + $0x58] sm:$0xff]  ;;  %v63_v14 = vld [vmem:[%s1994_s0 + $0x28] sm:$0xff] }
  0x21   :  { %1238 = vmatprep.subr.mxu0 %v75_v3  ;;  %1268 = vmatprep.subr.mxu1 %v309_v8  ;;  %v62_v12 = vld [vmem:[%s1994_s0 + $0x20] sm:$0xff]  ;;  %v305_v15 = vld [vmem:[#allocation2 + $0x50] sm:$0xff]  ;;  %v304_v17 = vld [vmem:[#allocation2 + $0x48] sm:$0xff] }
  0x22   :  { %1239 = vmatpush3.msra.mxu0 %v75_v3  ;;  %1269 = vmatpush3.msra.mxu1 %v309_v8  ;;  %v64_v16 = vld [vmem:[%s1994_s0 + $0x30] sm:$0xff]  ;;  %v65_v18 = vld [vmem:[%s1994_s0 + $0x38] sm:$0xff]  ;;  %v303_v19 = vld [vmem:[#allocation2 + $0x40] sm:$0xff] }
  0x23   :  { %1240 = vmatprep.subr.mxu0 %v74_v4  ;;  %1270 = vmatprep.subr.mxu1 %v308_v9  ;;  %v66_v20 = vld [vmem:[%s1994_s0 + $0x40] sm:$0xff]  ;;  %v302_v21 = vld [vmem:[#allocation2 + $0x38] sm:$0xff]  ;;  %v67_v22 = vld [vmem:[%s1994_s0 + $0x48] sm:$0xff] }
  0x24   :  { %1241 = vmatpush3.msra.mxu0 %v74_v4  ;;  %1271 = vmatpush3.msra.mxu1 %v308_v9  ;;  %v301_v23 = vld [vmem:[#allocation2 + $0x30] sm:$0xff]  ;;  %v300_v25 = vld [vmem:[#allocation2 + $0x28] sm:$0xff]  ;;  %v69_v26 = vld [vmem:[%s1994_s0 + $0x58] sm:$0xff] }
  0x25   :  { %1243 = vmatmul.mubr.msk.f32.vlgmr.msra.gmra.mxu0 %vm85_vm0, %v59_v5  ;;  %1272 = vmatprep.subr.mxu1 %v307_v11  ;;  %v68_v24 = vld [vmem:[%s1994_s0 + $0x50] sm:$0xff]  ;;  %v299_v27 = vld [vmem:[#allocation2 + $0x20] sm:$0xff]  ;;  %v298_v29 = vld [vmem:[#allocation2 + $0x18] sm:$0xff] }
  0x26   :  { %1245 = vmatprep.mubr.msk.f32.mxu0 %vm85_vm0, %v60_v7  ;;  %1273 = vmatpush3.msra.mxu1 %v307_v11  ;;  %v70_v28 = vld [vmem:[%s1994_s0 + $0x60] sm:$0xff]  ;;  %v71_v30 = vld [vmem:[%s1994_s0 + $0x68] sm:$0xff]  ;;  %v72_v31 = vld [vmem:[%s1994_s0 + $0x70] sm:$0xff] }
  0x27   :  { %1274 = vmatprep.subr.mxu1 %v306_v13  ;;  %v73_v32 = vld [vmem:[%s1994_s0 + $0x78] sm:$0xff]  ;;  %v297_v33 = vld [vmem:[#allocation2 + $0x10] sm:$0xff]  ;;  %v296_v34 = vld [vmem:[#allocation2 + $0x8] sm:$0xff] }
  0x28   :  { %1275 = vmatpush3.msra.mxu1 %v306_v13  ;;  %v295_v35 = vld [vmem:[#allocation2] sm:$0xff]  ;;  %v639_v6 = vld [vmem:[#allocation5 + $0x78] sm:$0xff]  ;;  %v638_v7 = vld [vmem:[#allocation5 + $0x70] sm:$0xff] }
  0x29   :  { %1246 = vmatmul.mubr.msk.f32.gmra.mxu0 %vm85_vm0, %v61_v10  ;;  %1276 = vmatprep.subr.mxu1 %v305_v15  ;;  %v1067_v37 = vld [vmem:[%s1996_s2] ss:$0 sm:$0xff]  ;;  %v637_v8 = vld [vmem:[#allocation5 + $0x68] sm:$0xff]  ;;  %v635_v10 = vld [vmem:[#allocation5 + $0x58] sm:$0xff] }
  0x2a   :  { %1248 = vmatprep.mubr.msk.f32.mxu0 %vm85_vm0, %v62_v12  ;;  %1277 = vmatpush3.msra.mxu1 %v305_v15  ;;  %v1769_v5 = vld [vmem:[%s1997_s3] sm:$0xff]  ;;  %v634_v11 = vld [vmem:[#allocation5 + $0x50] sm:$0xff]  ;;  %v633_v12 = vld [vmem:[#allocation5 + $0x48] sm:$0xff] }
  0x2b   :  { %1278 = vmatprep.subr.mxu1 %v304_v17  ;;  %v636_v9 = vld [vmem:[#allocation5 + $0x60] sm:$0xff]  ;;  %v630_v15 = vld [vmem:[#allocation5 + $0x30] sm:$0xff] }
  0x2c   :  { %1279 = vmatpush3.msra.mxu1 %v304_v17  ;;  %v632_v13 = vld [vmem:[#allocation5 + $0x40] sm:$0xff] }
  0x2d   :  { %1249 = vmatmul.mubr.msk.f32.gmra.mxu0 %vm85_vm0, %v63_v14  ;;  %1280 = vmatprep.subr.mxu1 %v303_v19  ;;  %v631_v14 = vld [vmem:[#allocation5 + $0x38] sm:$0xff]  ;;  %v628_v17 = vld [vmem:[#allocation5 + $0x20] sm:$0xff] }
  0x2e   :  { %1251 = vmatprep.mubr.msk.f32.mxu0 %vm85_vm0, %v64_v16  ;;  %1281 = vmatpush3.msra.mxu1 %v303_v19  ;;  %v629_v16 = vld [vmem:[#allocation5 + $0x28] sm:$0xff] }
  0x2f   :  { %1282 = vmatprep.subr.mxu1 %v302_v21 }
  0x30   :  { %1283 = vmatpush3.msra.mxu1 %v302_v21 }
  0x31   :  { %1252 = vmatmul.mubr.msk.f32.gmra.mxu0 %vm85_vm0, %v65_v18  ;;  %1284 = vmatprep.subr.mxu1 %v301_v23 }
  0x32   :  { %1254 = vmatprep.mubr.msk.f32.mxu0 %vm85_vm0, %v66_v20  ;;  %1285 = vmatpush3.msra.mxu1 %v301_v23 }
  0x33   :  { %1286 = vmatprep.subr.mxu1 %v300_v25 }
  0x34   :  { %1287 = vmatpush3.msra.mxu1 %v300_v25 }
  0x35   :  { %1255 = vmatmul.mubr.msk.f32.gmra.mxu0 %vm85_vm0, %v67_v22  ;;  %1288 = vmatprep.subr.mxu1 %v299_v27 }
  0x36   :  { %1257 = vmatprep.mubr.msk.f32.mxu0 %vm85_vm0, %v68_v24  ;;  %1289 = vmatpush3.msra.mxu1 %v299_v27 }
  0x37   :  { %1290 = vmatprep.subr.mxu1 %v298_v29 }
  0x38   :  { %1291 = vmatpush3.msra.mxu1 %v298_v29 }
  0x39   :  { %1258 = vmatmul.mubr.msk.f32.gmra.mxu0 %vm85_vm0, %v69_v26  ;;  %1292 = vmatprep.subr.mxu1 %v297_v33 }
  0x3a   :  { %1260 = vmatprep.mubr.msk.f32.mxu0 %vm85_vm0, %v70_v28  ;;  %1293 = vmatpush3.msra.mxu1 %v297_v33 }
  0x3b   :  { %1294 = vmatprep.subr.mxu1 %v296_v34 }
  0x3c   :  { %1295 = vmatpush3.msra.mxu1 %v296_v34  ;;  %v1775_v34 = vld [vmem:[%s1997_s3 + $0x8] sm:$0xff] }
  0x3d   :  { %1261 = vmatmul.mubr.msk.f32.gmra.mxu0 %vm85_vm0, %v71_v30  ;;  %1296 = vmatprep.subr.mxu1 %v295_v35 }
  0x3e   :  { %1263 = vmatprep.mubr.msk.f32.mxu0 %vm85_vm0, %v72_v31  ;;  %1297 = vmatpush3.msra.mxu1 %v295_v35  ;;  %v1780_v35 = vld [vmem:[%s1997_s3 + $0x10] sm:$0xff] }
  0x3f   :  { %1378 = vmatprep.subr.mxu1 %v639_v6 }
  0x41   :  { %1264 = vmatmul.mubr.msk.f32.gmra.mxu0 %vm85_vm0, %v73_v32 }
  0x42   :  { %1354 = vmatprep.mubr.f32.mxu0 %v1769_v5 }
  0xe5   :  { %v1244_v36 = vpop.f32.mrf.mxu0 }
  0xe6   :  { %v206_v40 = vadd.f32 %v1244_v36, %v1067_v37  ;;  %v1787_v36 = vld [vmem:[%s1997_s3 + $0x18] sm:$0xff] }
  0xe7   :  { %v200_v38 = vpop.f32.mrf.mxu0 }
  0xe8   :  { %v201_v39 = vadd.f32 %v1067_v37, %v200_v38  ;;  %v1799_v38 = vld [vmem:[%s1997_s3 + $0x28] sm:$0xff] }
  0xe9   :  { %v1247_v41 = vpop.f32.mrf.mxu0 }
  0xea   :  { %1298 = vmatprep.mubr.f32.mxu1 %v201_v39  ;;  %v216_v44 = vadd.f32 %v1247_v41, %v1067_v37  ;;  %v1804_v39 = vld [vmem:[%s1997_s3 + $0x30] sm:$0xff]  ;;  %v1816_v41 = vld [vmem:[%s1997_s3 + $0x40] sm:$0xff] }
  0xeb   :  { %v210_v42 = vpop.f32.mrf.mxu0  ;;  %1299 = vmatmul.mubr.f32.vlgmr.msra.gmra.mxu1 %v206_v40  ;;  %v1811_v40 = vld [vmem:[%s1997_s3 + $0x38] sm:$0xff] }
  0xec   :  { %v211_v43 = vadd.f32 %v1067_v37, %v210_v42  ;;  %1379 = vmatpush3.msra.mxu1 %v639_v6  ;;  %v1823_v42 = vld [vmem:[%s1997_s3 + $0x48] sm:$0xff] }
  0xed   :  { %v1250_v45 = vpop.f32.mrf.mxu0  ;;  %1380 = vmatprep.subr.mxu1 %v638_v7 }
  0xee   :  { %1301 = vmatprep.mubr.f32.mxu1 %v211_v43  ;;  %v226_v48 = vadd.f32 %v1250_v45, %v1067_v37  ;;  %1381 = vmatpush3.msra.mxu1 %v638_v7  ;;  %v1828_v43 = vld [vmem:[%s1997_s3 + $0x50] sm:$0xff]  ;;  %v1840_v45 = vld [vmem:[%s1997_s3 + $0x60] sm:$0xff] }
  0xef   :  { %v220_v46 = vpop.f32.mrf.mxu0  ;;  %1302 = vmatmul.mubr.f32.gmra.mxu1 %v216_v44  ;;  %1382 = vmatprep.subr.mxu1 %v637_v8  ;;  %v1835_v44 = vld [vmem:[%s1997_s3 + $0x58] sm:$0xff] }
  0xf0   :  { %v221_v47 = vadd.f32 %v1067_v37, %v220_v46  ;;  %1383 = vmatpush3.msra.mxu1 %v637_v8  ;;  %v1847_v46 = vld [vmem:[%s1997_s3 + $0x68] sm:$0xff] }
  0xf1   :  { %v1253_v49 = vpop.f32.mrf.mxu0  ;;  %1384 = vmatprep.subr.mxu1 %v636_v9 }
  0xf2   :  { %1304 = vmatprep.mubr.f32.mxu1 %v221_v47  ;;  %v236_v52 = vadd.f32 %v1253_v49, %v1067_v37  ;;  %1385 = vmatpush3.msra.mxu1 %v636_v9  ;;  %v1852_v47 = vld [vmem:[%s1997_s3 + $0x70] sm:$0xff]  ;;  %v627_v49 = vld [vmem:[#allocation5 + $0x18] sm:$0xff] }
  0xf3   :  { %v230_v50 = vpop.f32.mrf.mxu0  ;;  %1305 = vmatmul.mubr.f32.gmra.mxu1 %v226_v48  ;;  %1386 = vmatprep.subr.mxu1 %v635_v10  ;;  %v1859_v48 = vld [vmem:[%s1997_s3 + $0x78] sm:$0xff] }
  0xf4   :  { %v231_v51 = vadd.f32 %v1067_v37, %v230_v50  ;;  %1387 = vmatpush3.msra.mxu1 %v635_v10  ;;  %v626_v50 = vld [vmem:[#allocation5 + $0x10] sm:$0xff] }
  0xf5   :  { %v1256_v53 = vpop.f32.mrf.mxu0  ;;  %1388 = vmatprep.subr.mxu1 %v634_v11 }
  0xf6   :  { %1307 = vmatprep.mubr.f32.mxu1 %v231_v51  ;;  %v246_v56 = vadd.f32 %v1256_v53, %v1067_v37  ;;  %1389 = vmatpush3.msra.mxu1 %v634_v11  ;;  %v625_v51 = vld [vmem:[#allocation5 + $0x8] sm:$0xff]  ;;  %v1084_v53 = vld [vmem:[%s1999_s5] ss:$0 sm:$0xff] }
  0xf7   :  { %v240_v54 = vpop.f32.mrf.mxu0  ;;  %1308 = vmatmul.mubr.f32.gmra.mxu1 %v236_v52  ;;  %1390 = vmatprep.subr.mxu1 %v633_v12  ;;  %v624_v52 = vld [vmem:[#allocation5] sm:$0xff] }
  0xf8   :  { %v241_v55 = vadd.f32 %v1067_v37, %v240_v54  ;;  %1391 = vmatpush3.msra.mxu1 %v633_v12 }
  0xf9   :  { %v1259_v57 = vpop.f32.mrf.mxu0  ;;  %1392 = vmatprep.subr.mxu1 %v632_v13 }
  0xfa   :  { %1310 = vmatprep.mubr.f32.mxu1 %v241_v55  ;;  %v256_v60 = vadd.f32 %v1259_v57, %v1067_v37  ;;  %1393 = vmatpush3.msra.mxu1 %v632_v13 }
  0xfb   :  { %v250_v58 = vpop.f32.mrf.mxu0  ;;  %1311 = vmatmul.mubr.f32.gmra.mxu1 %v246_v56  ;;  %1394 = vmatprep.subr.mxu1 %v631_v14 }
  0xfc   :  { %v251_v59 = vadd.f32 %v1067_v37, %v250_v58  ;;  %1395 = vmatpush3.msra.mxu1 %v631_v14 }
  0xfd   :  { %v1262_v61 = vpop.f32.mrf.mxu0  ;;  %1396 = vmatprep.subr.mxu1 %v630_v15 }
  0xfe   :  { %1313 = vmatprep.mubr.f32.mxu1 %v251_v59  ;;  %v266_v0 = vadd.f32 %v1262_v61, %v1067_v37  ;;  %1397 = vmatpush3.msra.mxu1 %v630_v15 }
  0xff   :  { %v260_v62 = vpop.f32.mrf.mxu0  ;;  %1314 = vmatmul.mubr.f32.gmra.mxu1 %v256_v60  ;;  %1398 = vmatprep.subr.mxu1 %v629_v16 }
 0x100   :  { %v261_v63 = vadd.f32 %v1067_v37, %v260_v62  ;;  %1399 = vmatpush3.msra.mxu1 %v629_v16 }
 0x101   :  { %v1265_v1 = vpop.f32.mrf.mxu0  ;;  %1400 = vmatprep.subr.mxu1 %v628_v17 }
 0x102   :  { %1316 = vmatprep.mubr.f32.mxu1 %v261_v63  ;;  %v276_v4 = vadd.f32 %v1265_v1, %v1067_v37  ;;  %1401 = vmatpush3.msra.mxu1 %v628_v17 }
 0x103   :  { %v270_v2 = vpop.f32.mrf.mxu0  ;;  %1317 = vmatmul.mubr.f32.gmra.mxu1 %v266_v0  ;;  %1402 = vmatprep.subr.mxu1 %v627_v49 }
 0x104   :  { %v271_v3 = vadd.f32 %v1067_v37, %v270_v2  ;;  %v1792_v37 = vld [vmem:[%s1997_s3 + $0x20] sm:$0xff]  ;;  %1403 = vmatpush3.msra.mxu1 %v627_v49 }
 0x105   :  { %1404 = vmatprep.subr.mxu1 %v626_v50 }
 0x106   :  { %1319 = vmatprep.mubr.f32.mxu1 %v271_v3  ;;  %1405 = vmatpush3.msra.mxu1 %v626_v50 }
 0x107   :  { %1320 = vmatmul.mubr.f32.gmra.mxu1 %v276_v4  ;;  %1406 = vmatprep.subr.mxu1 %v625_v51 }
 0x108   :  { %1407 = vmatpush3.msra.mxu1 %v625_v51 }
 0x109   :  { %1408 = vmatprep.subr.mxu1 %v624_v52 }
 0x10a   :  { %1409 = vmatpush3.msra.mxu1 %v624_v52 }
 0x1ab   :  { %v1300_v18 = vpop.f32.mrf.mxu1 }
 0x1ad   :  { %v377_v19 = vpop.f32.mrf.mxu1 }
 0x1af   :  { %v1303_v20 = vpop.f32.mrf.mxu1 }
 0x1b1   :  { %v387_v21 = vpop.f32.mrf.mxu1 }
 0x1b3   :  { %v1306_v22 = vpop.f32.mrf.mxu1 }
 0x1b5   :  { %v397_v23 = vpop.f32.mrf.mxu1 }
 0x1b7   :  { %v1309_v24 = vpop.f32.mrf.mxu1 }
 0x1b9   :  { %v407_v25 = vpop.f32.mrf.mxu1 }
 0x1bb   :  { %v1312_v26 = vpop.f32.mrf.mxu1 }
 0x1bd   :  { %v417_v27 = vpop.f32.mrf.mxu1 }
 0x1bf   :  { %v1315_v28 = vpop.f32.mrf.mxu1 }
 0x1c1   :  { %v427_v29 = vpop.f32.mrf.mxu1 }
 0x1c3   :  { %v1318_v30 = vpop.f32.mrf.mxu1 }
 0x1c5   :  { %v437_v31 = vpop.f32.mrf.mxu1 }
 0x1c7   :  { %v1321_v32 = vpop.f32.mrf.mxu1 }
 0x1c8   :  { %1322 = vmatprep.subr.mxu0 %v1321_v32 }
 0x1c9   :  { %v447_v33 = vpop.f32.mrf.mxu1  ;;  %1323 = vmatpush3.msra.mxu0 %v1321_v32 }
 0x1ca   :  { %1324 = vmatprep.subr.mxu0 %v447_v33 }
 0x1cb   :  { %1325 = vmatpush3.msra.mxu0 %v447_v33 }
 0x1cc   :  { %1326 = vmatprep.subr.mxu0 %v1318_v30 }
 0x1cd   :  { %1327 = vmatpush3.msra.mxu0 %v1318_v30 }
 0x1ce   :  { %1328 = vmatprep.subr.mxu0 %v437_v31 }
 0x1cf   :  { %1329 = vmatpush3.msra.mxu0 %v437_v31 }
 0x1d0   :  { %1330 = vmatprep.subr.mxu0 %v1315_v28 }
 0x1d1   :  { %1331 = vmatpush3.msra.mxu0 %v1315_v28 }
 0x1d2   :  { %1332 = vmatprep.subr.mxu0 %v427_v29 }
 0x1d3   :  { %1333 = vmatpush3.msra.mxu0 %v427_v29 }
 0x1d4   :  { %1334 = vmatprep.subr.mxu0 %v1312_v26 }
 0x1d5   :  { %1335 = vmatpush3.msra.mxu0 %v1312_v26 }
 0x1d6   :  { %1336 = vmatprep.subr.mxu0 %v417_v27 }
 0x1d7   :  { %1337 = vmatpush3.msra.mxu0 %v417_v27 }
 0x1d8   :  { %1338 = vmatprep.subr.mxu0 %v1309_v24 }
 0x1d9   :  { %1339 = vmatpush3.msra.mxu0 %v1309_v24 }
 0x1da   :  { %1340 = vmatprep.subr.mxu0 %v407_v25 }
 0x1db   :  { %1341 = vmatpush3.msra.mxu0 %v407_v25 }
 0x1dc   :  { %1342 = vmatprep.subr.mxu0 %v1306_v22 }
 0x1dd   :  { %1343 = vmatpush3.msra.mxu0 %v1306_v22 }
 0x1de   :  { %1344 = vmatprep.subr.mxu0 %v397_v23 }
 0x1df   :  { %1345 = vmatpush3.msra.mxu0 %v397_v23 }
 0x1e0   :  { %1346 = vmatprep.subr.mxu0 %v1303_v20 }
 0x1e1   :  { %1347 = vmatpush3.msra.mxu0 %v1303_v20 }
 0x1e2   :  { %1348 = vmatprep.subr.mxu0 %v387_v21 }
 0x1e3   :  { %1349 = vmatpush3.msra.mxu0 %v387_v21 }
 0x1e4   :  { %1350 = vmatprep.subr.mxu0 %v1300_v18 }
 0x1e5   :  { %1351 = vmatpush3.msra.mxu0 %v1300_v18 }
 0x1e6   :  { %1352 = vmatprep.subr.mxu0 %v377_v19 }
 0x1e7   :  { %1353 = vmatpush3.msra.mxu0 %v377_v19 }
 0x1e8   :  { %1355 = vmatmul.mubr.f32.vlgmr.msra.gmra.mxu0 %v1775_v34 }
 0x1e9   :  { %1357 = vmatprep.mubr.f32.mxu0 %v1780_v35 }
 0x1ec   :  { %1358 = vmatmul.mubr.f32.gmra.mxu0 %v1787_v36 }
 0x1ed   :  { %1360 = vmatprep.mubr.f32.mxu0 %v1792_v37 }
 0x1f0   :  { %1361 = vmatmul.mubr.f32.gmra.mxu0 %v1799_v38 }
 0x1f1   :  { %1363 = vmatprep.mubr.f32.mxu0 %v1804_v39 }
 0x1f4   :  { %1364 = vmatmul.mubr.f32.gmra.mxu0 %v1811_v40 }
 0x1f5   :  { %1366 = vmatprep.mubr.f32.mxu0 %v1816_v41 }
 0x1f8   :  { %1367 = vmatmul.mubr.f32.gmra.mxu0 %v1823_v42 }
 0x1f9   :  { %1369 = vmatprep.mubr.f32.mxu0 %v1828_v43 }
 0x1fc   :  { %1370 = vmatmul.mubr.f32.gmra.mxu0 %v1835_v44 }
 0x1fd   :  { %1372 = vmatprep.mubr.f32.mxu0 %v1840_v45 }
 0x200   :  { %1373 = vmatmul.mubr.f32.gmra.mxu0 %v1847_v46 }
 0x201   :  { %1375 = vmatprep.mubr.f32.mxu0 %v1852_v47 }
 0x204   :  { %1376 = vmatmul.mubr.f32.gmra.mxu0 %v1859_v48 }
 0x205   :  { %1466 = vmatprep.mubr.f32.mxu0 %v1769_v5 }
 0x2a8   :  { %v1356_v54 = vpop.f32.mrf.mxu0 }
 0x2a9   :  { %v535_v55 = vadd.f32 %v1356_v54, %v1084_v53 }
 0x2aa   :  { %v529_v56 = vpop.f32.mrf.mxu0 }
 0x2ab   :  { %v530_v57 = vadd.f32 %v1084_v53, %v529_v56  ;;  %v609_v60 = vmax.f32 %v535_v55, 0.0 }
 0x2ac   :  { %v1359_v58 = vpop.f32.mrf.mxu0 }
 0x2ad   :  { %v608_v59 = vmax.f32 %v530_v57, 0.0  ;;  %v545_v61 = vadd.f32 %v1359_v58, %v1084_v53 }
 0x2ae   :  { %v539_v62 = vpop.f32.mrf.mxu0 }
 0x2af   :  { %v540_v63 = vadd.f32 %v1084_v53, %v539_v62  ;;  %1410 = vmatprep.mubr.f32.mxu1 %v608_v59  ;;  %v611_v2 = vmax.f32 %v545_v61, 0.0 }
 0x2b0   :  { %v1362_v0 = vpop.f32.mrf.mxu0  ;;  %1411 = vmatmul.mubr.f32.vlgmr.msra.gmra.mxu1 %v609_v60 }
 0x2b1   :  { %v610_v1 = vmax.f32 %v540_v63, 0.0  ;;  %v555_v3 = vadd.f32 %v1362_v0, %v1084_v53 }
 0x2b2   :  { %v549_v4 = vpop.f32.mrf.mxu0 }
 0x2b3   :  { %v550_v5 = vadd.f32 %v1084_v53, %v549_v4  ;;  %1413 = vmatprep.mubr.f32.mxu1 %v610_v1  ;;  %v613_v8 = vmax.f32 %v555_v3, 0.0 }
 0x2b4   :  { %v1365_v6 = vpop.f32.mrf.mxu0  ;;  %1414 = vmatmul.mubr.f32.gmra.mxu1 %v611_v2 }
 0x2b5   :  { %v612_v7 = vmax.f32 %v550_v5, 0.0  ;;  %v565_v9 = vadd.f32 %v1365_v6, %v1084_v53 }
 0x2b6   :  { %v559_v10 = vpop.f32.mrf.mxu0 }
 0x2b7   :  { %v560_v11 = vadd.f32 %v1084_v53, %v559_v10  ;;  %1416 = vmatprep.mubr.f32.mxu1 %v612_v7  ;;  %v615_v14 = vmax.f32 %v565_v9, 0.0 }
 0x2b8   :  { %v1368_v12 = vpop.f32.mrf.mxu0  ;;  %1417 = vmatmul.mubr.f32.gmra.mxu1 %v613_v8 }
 0x2b9   :  { %v614_v13 = vmax.f32 %v560_v11, 0.0  ;;  %v575_v15 = vadd.f32 %v1368_v12, %v1084_v53 }
 0x2ba   :  { %v569_v16 = vpop.f32.mrf.mxu0 }
 0x2bb   :  { %v570_v17 = vadd.f32 %v1084_v53, %v569_v16  ;;  %1419 = vmatprep.mubr.f32.mxu1 %v614_v13  ;;  %v617_v20 = vmax.f32 %v575_v15, 0.0 }
 0x2bc   :  { %v1371_v18 = vpop.f32.mrf.mxu0  ;;  %1420 = vmatmul.mubr.f32.gmra.mxu1 %v615_v14 }
 0x2bd   :  { %v616_v19 = vmax.f32 %v570_v17, 0.0  ;;  %v585_v21 = vadd.f32 %v1371_v18, %v1084_v53 }
 0x2be   :  { %v579_v22 = vpop.f32.mrf.mxu0 }
 0x2bf   :  { %v580_v23 = vadd.f32 %v1084_v53, %v579_v22  ;;  %1422 = vmatprep.mubr.f32.mxu1 %v616_v19  ;;  %v619_v26 = vmax.f32 %v585_v21, 0.0 }
 0x2c0   :  { %v1374_v24 = vpop.f32.mrf.mxu0  ;;  %1423 = vmatmul.mubr.f32.gmra.mxu1 %v617_v20 }
 0x2c1   :  { %v618_v25 = vmax.f32 %v580_v23, 0.0  ;;  %v595_v27 = vadd.f32 %v1374_v24, %v1084_v53 }
 0x2c2   :  { %v589_v28 = vpop.f32.mrf.mxu0 }
 0x2c3   :  { %v590_v29 = vadd.f32 %v1084_v53, %v589_v28  ;;  %1425 = vmatprep.mubr.f32.mxu1 %v618_v25  ;;  %v621_v32 = vmax.f32 %v595_v27, 0.0 }
 0x2c4   :  { %v1377_v30 = vpop.f32.mrf.mxu0  ;;  %1426 = vmatmul.mubr.f32.gmra.mxu1 %v619_v26 }
 0x2c5   :  { %v620_v31 = vmax.f32 %v590_v29, 0.0  ;;  %v605_v33 = vadd.f32 %v1377_v30, %v1084_v53 }
 0x2c6   :  { %v599_v49 = vpop.f32.mrf.mxu0 }
 0x2c7   :  { %v600_v50 = vadd.f32 %v1084_v53, %v599_v49  ;;  %1428 = vmatprep.mubr.f32.mxu1 %v620_v31  ;;  %v623_v52 = vmax.f32 %v605_v33, 0.0 }
 0x2c8   :  { %1429 = vmatmul.mubr.f32.gmra.mxu1 %v621_v32 }
 0x2c9   :  { %v622_v51 = vmax.f32 %v600_v50, 0.0 }
 0x2cb   :  { %1431 = vmatprep.mubr.f32.mxu1 %v622_v51 }
 0x2cc   :  { %1432 = vmatmul.mubr.f32.gmra.mxu1 %v623_v52 }
 0x2cd   :  { %1487 = vmatprep.mubr.f32.mxu1 %v1852_v47 }
 0x370   :  { %v1867_v54 = vpop.f32.mrf.mxu1 }
 0x372   :  { %v1869_v55 = vpop.f32.mrf.mxu1 }
 0x374   :  { %v1871_v56 = vpop.f32.mrf.mxu1 }
 0x376   :  { %v1873_v57 = vpop.f32.mrf.mxu1 }
 0x378   :  { %v1418_v58 = vpop.f32.mrf.mxu1 }
 0x37a   :  { %v726_v59 = vpop.f32.mrf.mxu1 }
 0x37c   :  { %v1421_v60 = vpop.f32.mrf.mxu1 }
 0x37e   :  { %v736_v53 = vpop.f32.mrf.mxu1 }
 0x380   :  { %v1424_v61 = vpop.f32.mrf.mxu1 }
 0x382   :  { %v746_v62 = vpop.f32.mrf.mxu1 }
 0x384   :  { %v1427_v63 = vpop.f32.mrf.mxu1 }
 0x386   :  { %v756_v0 = vpop.f32.mrf.mxu1 }
 0x388   :  { %v1430_v1 = vpop.f32.mrf.mxu1 }
 0x38a   :  { %v766_v2 = vpop.f32.mrf.mxu1 }
 0x38c   :  { %v1433_v3 = vpop.f32.mrf.mxu1 }
 0x38d   :  { %1434 = vmatprep.subr.mxu0 %v1433_v3  ;;  %1490 = vmatprep.subr.mxu1 %v1433_v3 }
 0x38e   :  { %v776_v47 = vpop.f32.mrf.mxu1  ;;  %1435 = vmatpush3.msra.mxu0 %v1433_v3  ;;  %1506 = vmatpush3.msra.mxu1 %v1433_v3 }
 0x38f   :  { %1436 = vmatprep.subr.mxu0 %v776_v47  ;;  %1491 = vmatprep.subr.mxu1 %v776_v47 }
 0x390   :  { %1437 = vmatpush3.msra.mxu0 %v776_v47  ;;  %1507 = vmatpush3.msra.mxu1 %v776_v47 }
 0x391   :  { %1438 = vmatprep.subr.mxu0 %v1430_v1  ;;  %1492 = vmatprep.subr.mxu1 %v1430_v1 }
 0x392   :  { %1439 = vmatpush3.msra.mxu0 %v1430_v1  ;;  %1508 = vmatpush3.msra.mxu1 %v1430_v1 }
 0x393   :  { %1440 = vmatprep.subr.mxu0 %v766_v2  ;;  %1493 = vmatprep.subr.mxu1 %v766_v2 }
 0x394   :  { %1441 = vmatpush3.msra.mxu0 %v766_v2  ;;  %1509 = vmatpush3.msra.mxu1 %v766_v2 }
 0x395   :  { %1442 = vmatprep.subr.mxu0 %v1427_v63  ;;  %1494 = vmatprep.subr.mxu1 %v1427_v63 }
 0x396   :  { %1443 = vmatpush3.msra.mxu0 %v1427_v63  ;;  %1510 = vmatpush3.msra.mxu1 %v1427_v63 }
 0x397   :  { %1444 = vmatprep.subr.mxu0 %v756_v0  ;;  %1495 = vmatprep.subr.mxu1 %v756_v0 }
 0x398   :  { %1445 = vmatpush3.msra.mxu0 %v756_v0  ;;  %1511 = vmatpush3.msra.mxu1 %v756_v0 }
 0x399   :  { %1446 = vmatprep.subr.mxu0 %v1424_v61  ;;  %1496 = vmatprep.subr.mxu1 %v1424_v61 }
 0x39a   :  { %1447 = vmatpush3.msra.mxu0 %v1424_v61  ;;  %1512 = vmatpush3.msra.mxu1 %v1424_v61 }
 0x39b   :  { %1448 = vmatprep.subr.mxu0 %v746_v62  ;;  %1497 = vmatprep.subr.mxu1 %v746_v62 }
 0x39c   :  { %1449 = vmatpush3.msra.mxu0 %v746_v62  ;;  %1513 = vmatpush3.msra.mxu1 %v746_v62 }
 0x39d   :  { %1450 = vmatprep.subr.mxu0 %v1421_v60  ;;  %1498 = vmatprep.subr.mxu1 %v1421_v60 }
 0x39e   :  { %1451 = vmatpush3.msra.mxu0 %v1421_v60  ;;  %1514 = vmatpush3.msra.mxu1 %v1421_v60 }
 0x39f   :  { %1452 = vmatprep.subr.mxu0 %v736_v53  ;;  %1499 = vmatprep.subr.mxu1 %v736_v53 }
 0x3a0   :  { %1453 = vmatpush3.msra.mxu0 %v736_v53  ;;  %1515 = vmatpush3.msra.mxu1 %v736_v53 }
 0x3a1   :  { %1454 = vmatprep.subr.mxu0 %v1418_v58  ;;  %1500 = vmatprep.subr.mxu1 %v1418_v58 }
 0x3a2   :  { %1455 = vmatpush3.msra.mxu0 %v1418_v58  ;;  %1516 = vmatpush3.msra.mxu1 %v1418_v58 }
 0x3a3   :  { %1456 = vmatprep.subr.mxu0 %v726_v59  ;;  %1501 = vmatprep.subr.mxu1 %v726_v59 }
 0x3a4   :  { %1457 = vmatpush3.msra.mxu0 %v726_v59  ;;  %1517 = vmatpush3.msra.mxu1 %v726_v59 }
 0x3a5   :  { %1458 = vmatprep.subr.mxu0 %v1871_v56  ;;  %1502 = vmatprep.subr.mxu1 %v1871_v56 }
 0x3a6   :  { %1459 = vmatpush3.msra.mxu0 %v1871_v56  ;;  %1518 = vmatpush3.msra.mxu1 %v1871_v56 }
 0x3a7   :  { %1460 = vmatprep.subr.mxu0 %v1873_v57  ;;  %1503 = vmatprep.subr.mxu1 %v1873_v57 }
 0x3a8   :  { %1461 = vmatpush3.msra.mxu0 %v1873_v57  ;;  %1519 = vmatpush3.msra.mxu1 %v1873_v57 }
 0x3a9   :  { %1462 = vmatprep.subr.mxu0 %v1867_v54  ;;  %1504 = vmatprep.subr.mxu1 %v1867_v54 }
 0x3aa   :  { %1463 = vmatpush3.msra.mxu0 %v1867_v54  ;;  %1520 = vmatpush3.msra.mxu1 %v1867_v54 }
 0x3ab   :  { %1464 = vmatprep.subr.mxu0 %v1869_v55  ;;  %1505 = vmatprep.subr.mxu1 %v1869_v55 }
 0x3ac   :  { %1465 = vmatpush3.msra.mxu0 %v1869_v55  ;;  %1521 = vmatpush3.msra.mxu1 %v1869_v55 }
 0x3ad   :  { %1467 = vmatmul.mubr.f32.vlgmr.msra.gmra.mxu0 %v1775_v34  ;;  %1488 = vmatmul.mubr.f32.vlgmr.msra.gmra.mxu1 %v1859_v48  ;;  %v1085_v34 = vld [vmem:[%s2001_s7] ss:$0 sm:$0xff]  ;;  %s1629_s7 = smov [#allocation7]  }
 0x3ae   :  { %1469 = vmatprep.mubr.f32.mxu0 %v1780_v35  ;;  %s1054_s19 = sshll.u32 %s1629_s7, 4  ;;  %s1055_s19 = int_to_ptr.vmem [resolvable:$true] %s1054_s19 }
 0x3af   :  { %s1599_s20 = scalar_lea.vmem %s1055_s19, 2048  ;;  %p1604_p11 = scmp.lt.s32.totalorder %s1055_s19, %s1055_s19 }
 0x3b0   :  { %p1600_p10 = scmp.ne.s32.totalorder %s1055_s19, %s1599_s20  ;;  %p1605_p12 = scmp.lt.s32.totalorder %s1599_s20, %s1599_s20 }
 0x3b1   :  { %1470 = vmatmul.mubr.f32.gmra.mxu0 %v1787_v36 }
 0x3b2   :  { %1472 = vmatprep.mubr.f32.mxu0 %v1792_v37  ;;  %p1606_p13 = por %p1605_p12, %p1604_p11 }
 0x3b4   :  { %p1607_p0 = pnand %p1606_p13, %p1600_p10 }
 0x3b5   :  { %1473 = vmatmul.mubr.f32.gmra.mxu0 %v1799_v38 }
 0x3b6   :  { %1475 = vmatprep.mubr.f32.mxu0 %v1804_v39 }
 0x3b9   :  { %1476 = vmatmul.mubr.f32.gmra.mxu0 %v1811_v40 }
 0x3ba   :  { %1478 = vmatprep.mubr.f32.mxu0 %v1816_v41 }
 0x3bd   :  { %1479 = vmatmul.mubr.f32.gmra.mxu0 %v1823_v42 }
 0x3be   :  { %1481 = vmatprep.mubr.f32.mxu0 %v1828_v43 }
 0x3c1   :  { %1482 = vmatmul.mubr.f32.gmra.mxu0 %v1835_v44 }
 0x3c2   :  { %1484 = vmatprep.mubr.f32.mxu0 %v1840_v45 }
 0x3c5   :  { %1485 = vmatmul.mubr.f32.gmra.mxu0 %v1847_v46 }
 0x46d   :  { %v1468_v35 = vpop.f32.mrf.mxu0  ;;  %v1489_v20 = vpop.f32.mrf.mxu1 }
 0x46e   :  { %v1908_v36 = vadd.f32 %v1468_v35, %v1085_v34  ;;  %v1964_v50 = vadd.f32 %v1489_v20, %v1085_v34 }
 0x46f   :  { %v858_v37 = vpop.f32.mrf.mxu0  ;;  %v928_v27 = vpop.f32.mrf.mxu1 }
 0x470   :  { %v1910_v38 = vadd.f32 %v1085_v34, %v858_v37  ;;  %v938_v39 = vmul.f32 %v1908_v36, %v1908_v36  ;;  %v1960_v33 = vadd.f32 %v1085_v34, %v928_v27  ;;  %v952_v54 = vmul.f32 %v1964_v50, %v1964_v50 }
 0x471   :  { %v1471_v40 = vpop.f32.mrf.mxu0 }
 0x472   :  { %v1914_v41 = vadd.f32 %v1471_v40, %v1085_v34  ;;  %955 = vadd.xlane.f32.xlu0 %v938_v39  ;;  %v937_v45 = vmul.f32 %v1910_v38, %v1910_v38  ;;  %v951_v52 = vmul.f32 %v1960_v33, %v1960_v33 }
 0x473   :  { %v868_v42 = vpop.f32.mrf.mxu0 }
 0x474   :  { %v1916_v43 = vadd.f32 %v1085_v34, %v868_v42  ;;  %v940_v44 = vmul.f32 %v1914_v41, %v1914_v41 }
 0x475   :  { %v1474_v46 = vpop.f32.mrf.mxu0 }
 0x476   :  { %959 = vadd.xlane.f32.xlu1 %v940_v44  ;;  %953 = vadd.xlane.f32.xlu0 %v937_v45  ;;  %v1922_v4 = vadd.f32 %v1474_v46, %v1085_v34  ;;  %v939_v6 = vmul.f32 %v1916_v43, %v1916_v43 }
 0x477   :  { %v878_v48 = vpop.f32.mrf.mxu0 }
 0x478   :  { %v1924_v5 = vadd.f32 %v1085_v34, %v878_v48  ;;  %v942_v12 = vmul.f32 %v1922_v4, %v1922_v4 }
 0x479   :  { %v1477_v7 = vpop.f32.mrf.mxu0 }
 0x47a   :  { %957 = vadd.xlane.f32.xlu1 %v939_v6  ;;  %v941_v8 = vmul.f32 %v1924_v5, %v1924_v5  ;;  %v1930_v10 = vadd.f32 %v1477_v7, %v1085_v34 }
 0x47b   :  { %v888_v9 = vpop.f32.mrf.mxu0 }
 0x47c   :  { %v1932_v11 = vadd.f32 %v1085_v34, %v888_v9  ;;  %961 = vadd.xlane.f32.xlu0 %v941_v8  ;;  %v944_v18 = vmul.f32 %v1930_v10, %v1930_v10 }
 0x47d   :  { %v1480_v13 = vpop.f32.mrf.mxu0 }
 0x47e   :  { %963 = vadd.xlane.f32.xlu1 %v942_v12  ;;  %v943_v14 = vmul.f32 %v1932_v11, %v1932_v11  ;;  %v1938_v16 = vadd.f32 %v1480_v13, %v1085_v34 }
 0x47f   :  { %v898_v15 = vpop.f32.mrf.mxu0 }
 0x480   :  { %v1940_v17 = vadd.f32 %v1085_v34, %v898_v15  ;;  %965 = vadd.xlane.f32.xlu0 %v943_v14  ;;  %v946_v25 = vmul.f32 %v1938_v16, %v1938_v16 }
 0x481   :  { %v1483_v19 = vpop.f32.mrf.mxu0 }
 0x482   :  { %967 = vadd.xlane.f32.xlu1 %v944_v18  ;;  %v945_v21 = vmul.f32 %v1940_v17, %v1940_v17  ;;  %v1946_v23 = vadd.f32 %v1483_v19, %v1085_v34 }
 0x483   :  { %v908_v22 = vpop.f32.mrf.mxu0 }
 0x484   :  { %v1948_v24 = vadd.f32 %v1085_v34, %v908_v22  ;;  %969 = vadd.xlane.f32.xlu0 %v945_v21  ;;  %v948_v32 = vmul.f32 %v1946_v23, %v1946_v23 }
 0x485   :  { %v1486_v26 = vpop.f32.mrf.mxu0 }
 0x486   :  { %971 = vadd.xlane.f32.xlu1 %v946_v25  ;;  %v947_v28 = vmul.f32 %v1948_v24, %v1948_v24  ;;  %v1954_v30 = vadd.f32 %v1486_v26, %v1085_v34 }
 0x487   :  { %v918_v29 = vpop.f32.mrf.mxu0 }
 0x488   :  { %v1956_v31 = vadd.f32 %v1085_v34, %v918_v29  ;;  %973 = vadd.xlane.f32.xlu0 %v947_v28  ;;  %v950_v51 = vmul.f32 %v1954_v30, %v1954_v30 }
 0x48a   :  { %975 = vadd.xlane.f32.xlu1 %v948_v32  ;;  %v949_v49 = vmul.f32 %v1956_v31, %v1956_v31 }
 0x48c   :  { %977 = vadd.xlane.f32.xlu0 %v949_v49 }
 0x48e   :  { %979 = vadd.xlane.f32.xlu1 %v950_v51 }
 0x490   :  { %981 = vadd.xlane.f32.xlu0 %v951_v52 }
 0x492   :  { %983 = vadd.xlane.f32.xlu1 %v952_v54 }
 0x4fb   :  { %v956_v55 = vpop.xlane.xlu0 %955 }
 0x4fc   :  { %v986_v56 = vmax.f32 %v956_v55, 1e-24 }
 0x4fe   :  { %1527 = vrsqrt.f32 %v986_v56 }
 0x4ff   :  { %v960_v57 = vpop.xlane.xlu1 %959  ;;  %v954_v58 = vpop.xlane.xlu0 %953 }
 0x500   :  { %v988_v59 = vmax.f32 %v960_v57, 1e-24  ;;  %v985_v60 = vmax.f32 %v954_v58, 1e-24 }
 0x502   :  { %1529 = vrsqrt.f32 %v988_v59 }
 0x503   :  { %1531 = vrsqrt.f32 %v985_v60  ;;  %v958_v53 = vpop.xlane.xlu1 %957 }
 0x504   :  { %v987_v61 = vmax.f32 %v958_v53, 1e-24 }
 0x505   :  { %v962_v62 = vpop.xlane.xlu0 %961 }
 0x506   :  { %1533 = vrsqrt.f32 %v987_v61  ;;  %v989_v63 = vmax.f32 %v962_v62, 1e-24 }
 0x507   :  { %v964_v0 = vpop.xlane.xlu1 %963 }
 0x508   :  { %1535 = vrsqrt.f32 %v989_v63  ;;  %v990_v1 = vmax.f32 %v964_v0, 1e-24 }
 0x509   :  { %v966_v2 = vpop.xlane.xlu0 %965 }
 0x50a   :  { %1537 = vrsqrt.f32 %v990_v1  ;;  %v991_v3 = vmax.f32 %v966_v2, 1e-24 }
 0x50b   :  { %v1528_v47 = vpop.eup %1527  ;;  %v968_v34 = vpop.xlane.xlu1 %967 }
 0x50c   :  { %v1018_v35 = vmul.f32 %v1528_v47, %v1908_v36  ;;  %1539 = vrsqrt.f32 %v991_v3  ;;  %v992_v37 = vmax.f32 %v968_v34, 1e-24 }
 0x50d   :  { %v970_v39 = vpop.xlane.xlu0 %969 }
 0x50e   :  { %1034 = vst [vmem:[#allocation7 + $0x8] sm:$0xff] %v1018_v35  ;;  %1541 = vrsqrt.f32 %v992_v37  ;;  %v993_v40 = vmax.f32 %v970_v39, 1e-24 }
 0x50f   :  { %v1530_v42 = vpop.eup %1529  ;;  %v972_v44 = vpop.xlane.xlu1 %971 }
 0x510   :  { %v1532_v45 = vpop.eup %1531  ;;  %v1020_v46 = vmul.f32 %v1530_v42, %v1914_v41  ;;  %1543 = vrsqrt.f32 %v993_v40  ;;  %v994_v48 = vmax.f32 %v972_v44, 1e-24 }
 0x511   :  { %v1017_v6 = vmul.f32 %v1532_v45, %v1910_v38  ;;  %v974_v7 = vpop.xlane.xlu0 %973 }
 0x512   :  { %1036 = vst [vmem:[#allocation7 + $0x18] sm:$0xff] %v1020_v46  ;;  %1545 = vrsqrt.f32 %v994_v48  ;;  %v995_v8 = vmax.f32 %v974_v7, 1e-24 }
 0x513   :  { %v1534_v36 = vpop.eup %1533  ;;  %1033 = vst [vmem:[#allocation7] sm:$0xff] %v1017_v6  ;;  %v976_v9 = vpop.xlane.xlu1 %975 }
 0x514   :  { %v1019_v12 = vmul.f32 %v1534_v36, %v1916_v43  ;;  %1547 = vrsqrt.f32 %v995_v8  ;;  %v996_v13 = vmax.f32 %v976_v9, 1e-24 }
 0x515   :  { %v1536_v14 = vpop.eup %1535  ;;  %v978_v15 = vpop.xlane.xlu0 %977 }
 0x516   :  { %1035 = vst [vmem:[#allocation7 + $0x10] sm:$0xff] %v1019_v12  ;;  %v1021_v41 = vmul.f32 %v1536_v14, %v1924_v5  ;;  %1549 = vrsqrt.f32 %v996_v13  ;;  %v997_v18 = vmax.f32 %v978_v15, 1e-24 }
 0x517   :  { %v1538_v19 = vpop.eup %1537  ;;  %v980_v38 = vpop.xlane.xlu1 %979 }
 0x518   :  { %1037 = vst [vmem:[#allocation7 + $0x20] sm:$0xff] %v1021_v41  ;;  %v1022_v20 = vmul.f32 %v1538_v19, %v1922_v4  ;;  %1551 = vrsqrt.f32 %v997_v18  ;;  %v998_v21 = vmax.f32 %v980_v38, 1e-24 }
 0x519   :  { %v1540_v22 = vpop.eup %1539  ;;  %v982_v25 = vpop.xlane.xlu0 %981 }
 0x51a   :  { %1038 = vst [vmem:[#allocation7 + $0x28] sm:$0xff] %v1022_v20  ;;  %v1023_v43 = vmul.f32 %v1540_v22, %v1932_v11  ;;  %1553 = vrsqrt.f32 %v998_v21  ;;  %v999_v26 = vmax.f32 %v982_v25, 1e-24 }
 0x51b   :  { %v1542_v27 = vpop.eup %1541  ;;  %v984_v28 = vpop.xlane.xlu1 %983 }
 0x51c   :  { %1039 = vst [vmem:[#allocation7 + $0x30] sm:$0xff] %v1023_v43  ;;  %v1024_v5 = vmul.f32 %v1542_v27, %v1930_v10  ;;  %1555 = vrsqrt.f32 %v999_v26  ;;  %v1000_v29 = vmax.f32 %v984_v28, 1e-24 }
 0x51d   :  { %v1544_v32 = vpop.eup %1543 }
 0x51e   :  { %1040 = vst [vmem:[#allocation7 + $0x38] sm:$0xff] %v1024_v5  ;;  %v1025_v4 = vmul.f32 %v1544_v32, %v1940_v17  ;;  %1557 = vrsqrt.f32 %v1000_v29 }
 0x51f   :  { %v1546_v49 = vpop.eup %1545 }
 0x520   :  { %1041 = vst [vmem:[#allocation7 + $0x40] sm:$0xff] %v1025_v4  ;;  %v1026_v51 = vmul.f32 %v1546_v49, %v1938_v16 }
 0x521   :  { %v1548_v52 = vpop.eup %1547 }
 0x522   :  { %1042 = vst [vmem:[#allocation7 + $0x48] sm:$0xff] %v1026_v51  ;;  %v1027_v11 = vmul.f32 %v1548_v52, %v1948_v24 }
 0x523   :  { %v1550_v54 = vpop.eup %1549 }
 0x524   :  { %1043 = vst [vmem:[#allocation7 + $0x50] sm:$0xff] %v1027_v11  ;;  %v1028_v55 = vmul.f32 %v1550_v54, %v1946_v23 }
 0x525   :  { %v1552_v10 = vpop.eup %1551 }
 0x526   :  { %1044 = vst [vmem:[#allocation7 + $0x58] sm:$0xff] %v1028_v55  ;;  %v1029_v56 = vmul.f32 %v1552_v10, %v1956_v31 }
 0x527   :  { %v1554_v57 = vpop.eup %1553 }
 0x528   :  { %1045 = vst [vmem:[#allocation7 + $0x60] sm:$0xff] %v1029_v56  ;;  %v1030_v17 = vmul.f32 %v1554_v57, %v1954_v30 }
 0x529   :  { %v1556_v58 = vpop.eup %1555 }
 0x52a   :  { %1046 = vst [vmem:[#allocation7 + $0x68] sm:$0xff] %v1030_v17  ;;  %v1031_v16 = vmul.f32 %v1556_v58, %v1960_v33 }
 0x52b   :  { %v1558_v59 = vpop.eup %1557 }
 0x52c   :  { %1047 = vst [vmem:[#allocation7 + $0x70] sm:$0xff] %v1031_v16  ;;  %v1032_v24 = vmul.f32 %v1558_v59, %v1964_v50 }
 0x52e   :  { %1048 = vst [vmem:[#allocation7 + $0x78] sm:$0xff] %v1032_v24 }
 0x52f   :  { %1610 = shalt.err (!%p1607_p0)
}
 0x530   :  { %1060 = dma.vmem_to_hbm [thread:$0]  %s1055_s19, 2048, %s2002_s8, [#allocation4], %s1626_s30, %s1626_s30, %s1627_s9  }
 0x531   :  { %1623 = dma.done.wait [#allocation4], 2048  }
 0x532   :  { %1624 = vsyncadd [#allocation4], 4294965248 }
 0x533   :  { %1064 = vsyncpa [#allocation3], 1 }
 0x534   :  { %1065 = vsyncpa [#allocation6], 1 }
 0x535   :  { %1066 = vsyncpa [#allocation4], 1 }

</bundles_post_ra>
